<compile_context>
chip_gen: v5e
topology: v5e:2x2
jax: 0.10.0
libtpu: 0.0.40
codegen_flags: <defaults>
</compile_context>

<pallas_src>
import functools

import jax
import jax.numpy as jnp
from jax.experimental import pallas as pl
from jax.experimental.pallas import tpu as pltpu

LANE = 128
BF16_ROWS = 16  # bf16 packs 16 rows per vreg sublane group


def _round_up(x, m):
    return ((x + m - 1) // m) * m


def _classifier_kernel(num_hidden, *refs):
    """One batch tile of the MLP forward pass, entirely in VMEM.

    refs layout:
      refs[0]                      : x_ref   [TB, input_size]   (f32, unpadded)
      refs[1 + 2*i], refs[2 + 2*i] : w_i, b_i (hidden layer i)  (bf16, f32)
      refs[1 + 2*num_hidden]       : w_out                      (bf16)
      refs[2 + 2*num_hidden]       : b_out  (f32; padded class cols = -1e30)
      refs[-1]                     : out_ref [TB, out_pad]      (f32)
    """
    x_ref = refs[0]
    out_ref = refs[-1]

    # Cast to bf16 in-kernel (avoids a wrapper-side pad+cast HBM pass on x).
    h = x_ref[...].astype(jnp.bfloat16)

    # Hidden layers: Linear -> ReLU -> Dropout (eval mode == identity).
    for i in range(num_hidden):
        w_ref = refs[1 + 2 * i]
        b_ref = refs[2 + 2 * i]
        acc = jnp.dot(h, w_ref[...], preferred_element_type=jnp.float32)
        acc = acc + b_ref[...]          # bias-add in f32
        acc = jnp.maximum(acc, 0.0)     # ReLU on the VPU
        h = acc.astype(jnp.bfloat16)    # back to bf16 for the next matmul

    # Output layer.  Padded class columns have zero weights and bias -1e30,
    # so they contribute exp(~-inf)=0 to the softmax normalization.
    w_out_ref = refs[1 + 2 * num_hidden]
    b_out_ref = refs[2 + 2 * num_hidden]
    logits = (
        jnp.dot(h, w_out_ref[...], preferred_element_type=jnp.float32)
        + b_out_ref[...]
    )

    # Numerically stable log_softmax along dim=1.
    m = jnp.max(logits, axis=1, keepdims=True)
    shifted = logits - m
    lse = jnp.log(jnp.sum(jnp.exp(shifted), axis=1, keepdims=True))
    out_ref[...] = (shifted - lse).astype(out_ref.dtype)


def classifier_forward(x, params):
    """Run the Classifier forward pass with a single Pallas kernel.

    Args:
      x: [B, input_size] float32.
      params: list of (W, b) tuples; the last one is the output layer.
              W is [in, out] (transpose of PyTorch's Linear weight), b is [1, out].
    Returns:
      [B, output_size] float32 log-probabilities.
    """
    num_layers = len(params)
    num_hidden = num_layers - 1
    batch, input_size = x.shape
    output_size = params[-1][0].shape[1]

    # Feature widths: input stays unpadded (its block equals the full dim);
    # every layer's output width is padded to a lane-dense multiple of 128.
    widths = [input_size] + [_round_up(w.shape[1], LANE) for w, _ in params]
    out_pad = widths[-1]

    # Batch tile: multiple of 16 (bf16 packing); >=2 grid steps for batch > 128
    # (v7x has 2 TensorCores); large tiles for big batches to amortize the
    # ~0.35 us/step grid overhead and keep the 256-wide MXU full.
    b16 = _round_up(batch, BF16_ROWS)
    if batch <= 128:
        tb = b16
    elif batch <= 1024:
        tb = min(512, _round_up(-(-b16 // 2), BF16_ROWS))
    else:
        tb = 512
    b_pad = _round_up(batch, tb)
    grid = (b_pad // tb,)

    # Pad x (f32, batch axis only, zeros) only when the tile doesn't divide it.
    x_in = x if b_pad == batch else jnp.pad(x, ((0, b_pad - batch), (0, 0)))

    flat_inputs = [x_in]
    in_specs = [pl.BlockSpec((tb, input_size), lambda i: (i, 0))]
    for idx, (w, b) in enumerate(params):
        in_w, out_w = widths[idx], widths[idx + 1]
        w_p = jnp.pad(
            w.astype(jnp.bfloat16),
            ((0, in_w - w.shape[0]), (0, out_w - w.shape[1])),
        )
        if idx < num_hidden:
            # Zero bias on padded hidden columns -> ReLU(0)=0 -> inert downstream.
            b_p = jnp.pad(b.astype(jnp.float32), ((0, 0), (0, out_w - b.shape[1])))
        else:
            # Padded class columns must not perturb log_softmax.
            b_p = jnp.pad(
                b.astype(jnp.float32),
                ((0, 0), (0, out_w - b.shape[1])),
                constant_values=-1e30,
            )
        flat_inputs += [w_p, b_p]
        # Constant block index + single buffer: weights/biases live in VMEM
        # exactly once and are never re-DMA'd across batch-grid steps.
        in_specs.append(
            pl.BlockSpec((in_w, out_w), lambda i: (0, 0),
                         pipeline_mode=pl.Buffered(1))
        )
        in_specs.append(
            pl.BlockSpec((1, out_w), lambda i: (0, 0),
                         pipeline_mode=pl.Buffered(1))
        )

    out_specs = pl.BlockSpec((tb, out_pad), lambda i: (i, 0))

    # Advisory cost estimate for the XLA scheduler.
    flops = 2 * b_pad * sum(widths[i] * widths[i + 1] for i in range(num_layers))
    transcendentals = b_pad * out_pad
    bytes_accessed = sum(int(a.size) * a.dtype.itemsize for a in flat_inputs)
    bytes_accessed += b_pad * out_pad * 4
    cost = pl.CostEstimate(
        flops=flops, transcendentals=transcendentals, bytes_accessed=bytes_accessed
    )

    # VMEM budget (consistent with the Buffered(1) change):
    #   weights/biases x1, x/out tiles x2 (double-buffered), plus live f32 acc
    #   and bf16 activations of the widest layer (+ bf16 cast of the x tile).
    weight_bytes = sum(int(a.size) * a.dtype.itemsize for a in flat_inputs[1:])
    max_w = max(widths)
    tile_bytes = 2 * tb * input_size * 4 + 2 * tb * out_pad * 4
    act_bytes = tb * max_w * (4 + 2) + tb * input_size * 2
    vmem_needed = weight_bytes + tile_bytes + act_bytes

    try:
        vmem_cap = int(pltpu.get_tpu_info().vmem_capacity_bytes)
    except Exception:  # pragma: no cover - query unavailable off-device
        vmem_cap = 64 * 1024 * 1024  # conservative: v7x per-core VMEM

    # Fully-resident weights must fit this generation's VMEM; fail loudly.
    # TODO(synk): add a K/N-tiled fallback (extra grid axis or
    # pltpu.emit_pipeline over the contraction dim) for wider layers.
    if weight_bytes > 0.6 * vmem_cap:
        raise ValueError(
            f"Resident weights ({weight_bytes / 2**20:.1f} MiB) exceed the VMEM "
            f"budget of this TPU ({vmem_cap / 2**20:.0f} MiB); a tiled fallback "
            "is required."
        )

    compiler_kwargs = dict(dimension_semantics=("parallel",))
    if vmem_needed > 12 * 1024 * 1024:  # above the v5e default scoped limit
        compiler_kwargs["vmem_limit_bytes"] = int(
            min(2 * vmem_needed, 0.75 * vmem_cap)  # 25% headroom for Mosaic scratch
        )

    kernel = functools.partial(_classifier_kernel, num_hidden)
    out_padded = pl.pallas_call(
        kernel,
        out_shape=jax.ShapeDtypeStruct((b_pad, out_pad), jnp.float32),
        grid=grid,
        in_specs=in_specs,
        out_specs=out_specs,
        compiler_params=pltpu.CompilerParams(**compiler_kwargs),
        cost_estimate=cost,
    )(*flat_inputs)

    return out_padded[:batch, :output_size]


def init_classifier_params(key, input_size, output_size, hidden_layers):
    """Deterministic parameter init (shapes match nn.Linear layers)."""
    sizes = [input_size] + list(hidden_layers) + [output_size]
    params = []
    for fan_in, fan_out in zip(sizes[:-1], sizes[1:]):
        key, wk, bk = jax.random.split(key, 3)
        bound = 1.0 / jnp.sqrt(fan_in)
        w = jax.random.uniform(
            wk, (fan_in, fan_out), jnp.float32, minval=-bound, maxval=bound
        )
        b = jax.random.uniform(
            bk, (1, fan_out), jnp.float32, minval=-bound, maxval=bound
        )
        params.append((w, b))
    return params


def _reference_forward(x, params):
    """Pure-JAX f32 reference (eval-mode dropout == identity)."""
    h = x
    for w, b in params[:-1]:
        h = jnp.maximum(h @ w + b, 0.0)
    logits = h @ params[-1][0] + params[-1][1]
    return jax.nn.log_softmax(logits, axis=1)


if __name__ == "__main__":
    key = jax.random.PRNGKey(0)

    batch = 8
    input_size = 32
    hidden_layers = [64, 32]
    output_size = 10

    key, xk = jax.random.split(key)
    x = jax.random.normal(xk, (batch, input_size), jnp.float32)
    params = init_classifier_params(key, input_size, output_size, hidden_layers)

    out = classifier_forward(x, params)
    out = jax.block_until_ready(out)

    # Shape + log_softmax normalization (rows sum to 1 in prob space).
    assert out.shape == (batch, output_size)
    row_sums = jnp.sum(jnp.exp(out), axis=1)
    assert jnp.allclose(row_sums, jnp.ones_like(row_sums), atol=1e-3)

    # bf16-matmul kernel vs f32 reference (loose tolerance for bf16).
    ref = _reference_forward(x, params)
    assert jnp.allclose(out, ref, atol=2e-1), float(jnp.max(jnp.abs(out - ref)))

    print("KERNEL_OK")
</pallas_src>

<mosaic_0001>
module attributes {stable_mosaic.version = 11 : i64} {
  func.func @_classifier_kernel(%arg0: i32, %arg1: memref<16x32xf32, #tpu.memory_space<vmem>>, %arg2: memref<32x128xbf16, #tpu.memory_space<vmem>>, %arg3: memref<1x128xf32, #tpu.memory_space<vmem>>, %arg4: memref<128x128xbf16, #tpu.memory_space<vmem>>, %arg5: memref<1x128xf32, #tpu.memory_space<vmem>>, %arg6: memref<128x128xbf16, #tpu.memory_space<vmem>>, %arg7: memref<1x128xf32, #tpu.memory_space<vmem>>, %arg8: memref<16x128xf32, #tpu.memory_space<vmem>>) attributes {dimension_semantics = [#tpu.dimension_semantics<parallel>], iteration_bounds = array<i64: 1>, scalar_prefetch = 0 : i64, scratch_operands = 0 : i64, tpu.core_type = #tpu.core_type<tc>, window_params = [{transform_indices = @transform_0, window_bounds = array<i64: 16, 32>}, {pipeline_mode = #tpu.pipeline_mode<synchronous>, transform_indices = @transform_1, window_bounds = array<i64: 32, 128>}, {pipeline_mode = #tpu.pipeline_mode<synchronous>, transform_indices = @transform_2, window_bounds = array<i64: 1, 128>}, {pipeline_mode = #tpu.pipeline_mode<synchronous>, transform_indices = @transform_3, window_bounds = array<i64: 128, 128>}, {pipeline_mode = #tpu.pipeline_mode<synchronous>, transform_indices = @transform_4, window_bounds = array<i64: 1, 128>}, {pipeline_mode = #tpu.pipeline_mode<synchronous>, transform_indices = @transform_5, window_bounds = array<i64: 128, 128>}, {pipeline_mode = #tpu.pipeline_mode<synchronous>, transform_indices = @transform_6, window_bounds = array<i64: 1, 128>}, {transform_indices = @transform_7, window_bounds = array<i64: 16, 128>}]} {
    %c0 = arith.constant 0 : index
    %c0_0 = arith.constant 0 : index
    %0 = vector.load %arg1[%c0, %c0_0] : memref<16x32xf32, #tpu.memory_space<vmem>>, vector<16x32xf32>
    %1 = arith.truncf %0 : vector<16x32xf32> to vector<16x32xbf16>
    %c0_1 = arith.constant 0 : index
    %c0_2 = arith.constant 0 : index
    %2 = vector.load %arg2[%c0_1, %c0_2] : memref<32x128xbf16, #tpu.memory_space<vmem>>, vector<32x128xbf16>
    %cst = arith.constant dense<0.000000e+00> : vector<16x128xf32>
    %3 = tpu.matmul %1, %2, %cst {dimension_numbers = #tpu.dot_dimension_numbers<[1], [0], [0], [1], [0, 0, 1, 1], [], []>} : vector<16x32xbf16>, vector<32x128xbf16>, vector<16x128xf32> -> vector<16x128xf32>
    %c0_3 = arith.constant 0 : index
    %c0_4 = arith.constant 0 : index
    %4 = vector.load %arg3[%c0_3, %c0_4] : memref<1x128xf32, #tpu.memory_space<vmem>>, vector<1x128xf32>
    %5 = vector.broadcast %4 : vector<1x128xf32> to vector<16x128xf32>
    %6 = arith.addf %3, %5 : vector<16x128xf32>
    %cst_5 = arith.constant 0.000000e+00 : f32
    %7 = vector.broadcast %cst_5 : f32 to vector<16x128xf32>
    %8 = arith.maximumf %6, %7 : vector<16x128xf32>
    %9 = arith.truncf %8 : vector<16x128xf32> to vector<16x128xbf16>
    %c0_6 = arith.constant 0 : index
    %c0_7 = arith.constant 0 : index
    %10 = vector.load %arg4[%c0_6, %c0_7] : memref<128x128xbf16, #tpu.memory_space<vmem>>, vector<128x128xbf16>
    %cst_8 = arith.constant dense<0.000000e+00> : vector<16x128xf32>
    %11 = tpu.matmul %9, %10, %cst_8 {dimension_numbers = #tpu.dot_dimension_numbers<[1], [0], [0], [1], [0, 0, 1, 1], [], []>} : vector<16x128xbf16>, vector<128x128xbf16>, vector<16x128xf32> -> vector<16x128xf32>
    %c0_9 = arith.constant 0 : index
    %c0_10 = arith.constant 0 : index
    %12 = vector.load %arg5[%c0_9, %c0_10] : memref<1x128xf32, #tpu.memory_space<vmem>>, vector<1x128xf32>
    %13 = vector.broadcast %12 : vector<1x128xf32> to vector<16x128xf32>
    %14 = arith.addf %11, %13 : vector<16x128xf32>
    %cst_11 = arith.constant 0.000000e+00 : f32
    %15 = vector.broadcast %cst_11 : f32 to vector<16x128xf32>
    %16 = arith.maximumf %14, %15 : vector<16x128xf32>
    %17 = arith.truncf %16 : vector<16x128xf32> to vector<16x128xbf16>
    %c0_12 = arith.constant 0 : index
    %c0_13 = arith.constant 0 : index
    %18 = vector.load %arg6[%c0_12, %c0_13] : memref<128x128xbf16, #tpu.memory_space<vmem>>, vector<128x128xbf16>
    %cst_14 = arith.constant dense<0.000000e+00> : vector<16x128xf32>
    %19 = tpu.matmul %17, %18, %cst_14 {dimension_numbers = #tpu.dot_dimension_numbers<[1], [0], [0], [1], [0, 0, 1, 1], [], []>} : vector<16x128xbf16>, vector<128x128xbf16>, vector<16x128xf32> -> vector<16x128xf32>
    %c0_15 = arith.constant 0 : index
    %c0_16 = arith.constant 0 : index
    %20 = vector.load %arg7[%c0_15, %c0_16] : memref<1x128xf32, #tpu.memory_space<vmem>>, vector<1x128xf32>
    %21 = vector.broadcast %20 : vector<1x128xf32> to vector<16x128xf32>
    %22 = arith.addf %19, %21 : vector<16x128xf32>
    %cst_17 = arith.constant dense<0xFF800000> : vector<16xf32>
    %23 = vector.multi_reduction <maximumf>, %22, %cst_17 [1] : vector<16x128xf32> to vector<16xf32>
    %24 = vector.shape_cast %23 : vector<16xf32> to vector<16x1xf32>
    %25 = vector.broadcast %24 : vector<16x1xf32> to vector<16x128xf32>
    %26 = arith.subf %22, %25 : vector<16x128xf32>
    %27 = math.exp %26 : vector<16x128xf32>
    %cst_18 = arith.constant dense<0.000000e+00> : vector<16xf32>
    %28 = vector.multi_reduction <add>, %27, %cst_18 [1] : vector<16x128xf32> to vector<16xf32>
    %29 = vector.shape_cast %28 : vector<16xf32> to vector<16x1xf32>
    %30 = math.log %29 : vector<16x1xf32>
    %31 = vector.broadcast %30 : vector<16x1xf32> to vector<16x128xf32>
    %32 = arith.subf %26, %31 : vector<16x128xf32>
    %c0_19 = arith.constant 0 : index
    %c0_20 = arith.constant 0 : index
    %33 = vector.load %arg8[%c0_19, %c0_20] : memref<16x128xf32, #tpu.memory_space<vmem>>, vector<16x128xf32>
    tpu.vector_store %arg8[%c0_19, %c0_20], %32 {strides = array<i32>} : memref<16x128xf32, #tpu.memory_space<vmem>>, vector<16x128xf32>,
    return
  }
  func.func @transform_0(%arg0: i32) -> (i32, i32) {
    %c0_i32 = arith.constant 0 : i32
    %c0_i32_0 = arith.constant 0 : i32
    return %arg0, %c0_i32 : i32, i32
  }
  func.func @transform_1(%arg0: i32) -> (i32, i32) {
    %c0_i32 = arith.constant 0 : i32
    %c0_i32_0 = arith.constant 0 : i32
    %c0_i32_1 = arith.constant 0 : i32
    return %c0_i32, %c0_i32_0 : i32, i32
  }
  func.func @transform_2(%arg0: i32) -> (i32, i32) {
    %c0_i32 = arith.constant 0 : i32
    %c0_i32_0 = arith.constant 0 : i32
    %c0_i32_1 = arith.constant 0 : i32
    return %c0_i32, %c0_i32_0 : i32, i32
  }
  func.func @transform_3(%arg0: i32) -> (i32, i32) {
    %c0_i32 = arith.constant 0 : i32
    %c0_i32_0 = arith.constant 0 : i32
    %c0_i32_1 = arith.constant 0 : i32
    return %c0_i32, %c0_i32_0 : i32, i32
  }
  func.func @transform_4(%arg0: i32) -> (i32, i32) {
    %c0_i32 = arith.constant 0 : i32
    %c0_i32_0 = arith.constant 0 : i32
    %c0_i32_1 = arith.constant 0 : i32
    return %c0_i32, %c0_i32_0 : i32, i32
  }
  func.func @transform_5(%arg0: i32) -> (i32, i32) {
    %c0_i32 = arith.constant 0 : i32
    %c0_i32_0 = arith.constant 0 : i32
    %c0_i32_1 = arith.constant 0 : i32
    return %c0_i32, %c0_i32_0 : i32, i32
  }
  func.func @transform_6(%arg0: i32) -> (i32, i32) {
    %c0_i32 = arith.constant 0 : i32
    %c0_i32_0 = arith.constant 0 : i32
    %c0_i32_1 = arith.constant 0 : i32
    return %c0_i32, %c0_i32_0 : i32, i32
  }
  func.func @transform_7(%arg0: i32) -> (i32, i32) {
    %c0_i32 = arith.constant 0 : i32
    %c0_i32_0 = arith.constant 0 : i32
    return %arg0, %c0_i32 : i32, i32
  }
}

</mosaic_0001>

<bundles_post_ra>
// kernel: tpu_custom_call.1
= control target key start
LH: loop header
LB: loop body
LE: loop exit
PB: predicated region body
PF: predicated region fallthrough
CT: control target
= control target key end

     0   :  { %12 = vsyncpa [#allocation3], 0  ;;  %s663_s0 = inlined_call_operand.hbm [shape: f32[16,32], index: 0, kind: input, shape index: {}]   ;;  %s664_s1 = inlined_call_operand.hbm [shape: bf16[32,128], index: 1, kind: input, shape index: {}]   ;;  %s665_s2 = inlined_call_operand.vmem [shape: f32[1,128], index: 2, kind: input, shape index: {}]   ;;  %s666_s3 = inlined_call_operand.hbm [shape: bf16[128,128], index: 3, kind: input, shape index: {}]   ;;  %s667_s4 = inlined_call_operand.vmem [shape: f32[1,128], index: 4, kind: input, shape index: {}]   ;;  %s668_s5 = inlined_call_operand.hbm [shape: bf16[128,128], index: 5, kind: input, shape index: {}]   ;;  %s669_s6 = inlined_call_operand.vmem [shape: f32[1,128], index: 6, kind: input, shape index: {}]   ;;  %s670_s7 = inlined_call_operand.hbm [shape: f32[16,128], index: 7, kind: output, shape index: {}]  }
   0x1   :  { %13 = vsyncpa [#allocation6], 0 }
   0x2   :  { %14 = vsyncpa [#allocation9], 0  ;;  %s33_s26 = sshll.u32 %s664_s1, 4  ;;  %s34_s26 = int_to_ptr.hbm [resolvable:$true] %s33_s26 }
   0x3   :  { %15 = vsyncpa [#allocation4], 0  ;;  %s584_s27 = smov [#allocation5]   ;;  %s20_s8 = sshll.u32 %s663_s0, 4  ;;  %s21_s8 = int_to_ptr.hbm [resolvable:$true] %s20_s8 }
   0x4   :  { %s35_s28 = sshll.u32 %s584_s27, 4  ;;  %s585_s9 = smov 64   ;;  %s36_s28 = int_to_ptr.vmem [resolvable:$true] %s35_s28 }
   0x5   :  { %s586_s10 = smov 4   ;;  %s587_s11 = smov [#allocation2]  }
   0x6   :  { %41 = dma.hbm_to_vmem [thread:$0]  %s34_s26, 256, %s36_s28, [#allocation6], %s585_s9, %s585_s9, %s586_s10  }
   0x7   :  { %s22_s12 = sshll.u32 %s587_s11, 4  ;;  %s588_s13 = smov 128   ;;  %s23_s12 = int_to_ptr.vmem [resolvable:$true] %s22_s12 }
   0x8   :  { %s589_s14 = smov 8   ;;  %s48_s16 = sshll.u32 %s666_s3, 4  ;;  %s49_s16 = int_to_ptr.hbm [resolvable:$true] %s48_s16 }
   0x9   :  { %28 = dma.hbm_to_vmem [thread:$0]  %s21_s8, 256, %s23_s12, [#allocation3], %s588_s13, %s588_s13, %s589_s14  }
   0xa   :  { %s590_s17 = smov [#allocation7]   ;;  %s63_s20 = sshll.u32 %s668_s5, 4  ;;  %s64_s20 = int_to_ptr.hbm [resolvable:$true] %s63_s20 }
   0xb   :  { %s50_s0 = sshll.u32 %s590_s17, 4  ;;  %s591_s21 = smov [#allocation8]   ;;  %s51_s0 = int_to_ptr.vmem [resolvable:$true] %s50_s0 }
   0xc   :  { %56 = dma.hbm_to_vmem [thread:$0]  %s49_s16, 1024, %s51_s0, [#allocation6], %s585_s9, %s585_s9, %s586_s10  }
   0xd   :  { %s65_s22 = sshll.u32 %s591_s21, 4  ;;  %s66_s22 = int_to_ptr.vmem [resolvable:$true] %s65_s22 }
   0xe   :  { %71 = dma.hbm_to_vmem [thread:$0]  %s64_s20, 1024, %s66_s22, [#allocation9], %s585_s9, %s585_s9, %s586_s10  }
   0xf   :  { %576 = dma.done.wait [#allocation3], 256  }
  0x10   :  { %577 = vsyncadd [#allocation3], 4294967040 }
  0x11   :  { %578 = dma.done.wait [#allocation6], 1280  }
  0x12   :  { %579 = vsyncadd [#allocation6], 4294966016 }
  0x13   :  { %580 = dma.done.wait [#allocation9], 1024  }
  0x14   :  { %581 = vsyncadd [#allocation9], 4294966272  ;;  %v419_v0 = vld [vmem:[#allocation5 + $0x8] sm:$0xff]  ;;  %v418_v1 = vld [vmem:[#allocation5] sm:$0xff]  ;;  %vm114_vm0 = vcmask 261120   ;;  %s330_s28 = sshll.u32 %s670_s7, 4  ;;  %s331_s28 = int_to_ptr.hbm [resolvable:$true] %s330_s28 }
  0x15   :  { %v427_v2 = vld [vmem:[#allocation7 + $0x38] sm:$0xff]  ;;  %124 = vmatpush.bf16.msra.mxu0 %v419_v0  ;;  %v91_v3 = vld [vmem:[#allocation2] sm:$0xff]  ;;  %v92_v4 = vld [vmem:[#allocation2 + $0x8] sm:$0xff] }
  0x16   :  { %203 = vmatpush.bf16.msra.mxu1 %v427_v2  ;;  %v426_v5 = vld [vmem:[#allocation7 + $0x30] sm:$0xff]  ;;  %v93_v6 = vpack.c.bf16 %v92_v4, %v91_v3  ;;  %v425_v7 = vld [vmem:[#allocation7 + $0x28] sm:$0xff]  ;;  %v424_v8 = vld [vmem:[#allocation7 + $0x20] sm:$0xff] }
  0x17   :  { %v423_v9 = vld [vmem:[#allocation7 + $0x18] sm:$0xff]  ;;  %v422_v10 = vld [vmem:[#allocation7 + $0x10] sm:$0xff]  ;;  %v421_v11 = vld [vmem:[#allocation7 + $0x8] sm:$0xff] }
  0x18   :  { %v420_v12 = vld [vmem:[#allocation7] sm:$0xff]  ;;  %v435_v13 = vld [vmem:[#allocation8 + $0x38] sm:$0xff]  ;;  %v434_v14 = vld [vmem:[#allocation8 + $0x30] sm:$0xff] }
  0x19   :  { %125 = vmatpush.bf16.msra.mxu0 %v418_v1  ;;  %288 = vmatpush.bf16.msra.mxu2 %v435_v13  ;;  %v433_v15 = vld [vmem:[#allocation8 + $0x28] sm:$0xff]  ;;  %v432_v16 = vld [vmem:[#allocation8 + $0x20] sm:$0xff]  ;;  %v431_v25 = vld [vmem:[#allocation8 + $0x18] sm:$0xff] }
  0x1a   :  { %204 = vmatpush.bf16.msra.mxu1 %v426_v5  ;;  %v445_v18 = vld [vmem:[%s665_s2] ss:$0 sm:$0xff]  ;;  %v430_v26 = vld [vmem:[#allocation8 + $0x10] sm:$0xff]  ;;  %v429_v27 = vld [vmem:[#allocation8 + $0x8] sm:$0xff] }
  0x1b   :  { %v428_v28 = vld [vmem:[#allocation8] sm:$0xff] }
  0x1c   :  { %353 = vmatmul.msk.bf16.vlgmr.msra.gmra.mxu0 %vm114_vm0, %v93_v6  ;;  %v446_v30 = vld [vmem:[%s667_s4] ss:$0 sm:$0xff]  ;;  %s592_s4 = smov [#allocation10]  }
  0x1d   :  { %289 = vmatpush.bf16.msra.mxu2 %v434_v14  ;;  %v447_v37 = vld [vmem:[%s669_s6] ss:$0 sm:$0xff]  ;;  %s328_s6 = sshll.u32 %s592_s4, 4  ;;  %s329_s6 = int_to_ptr.vmem [resolvable:$true] %s328_s6 }
  0x1e   :  { %205 = vmatpush.bf16.msra.mxu1 %v425_v7 }
  0x21   :  { %290 = vmatpush.bf16.msra.mxu2 %v433_v15 }
  0x22   :  { %206 = vmatpush.bf16.msra.mxu1 %v424_v8 }
  0x25   :  { %291 = vmatpush.bf16.msra.mxu2 %v432_v16 }
  0x26   :  { %207 = vmatpush.bf16.msra.mxu1 %v423_v9 }
  0x29   :  { %292 = vmatpush.bf16.msra.mxu2 %v431_v25 }
  0x2a   :  { %208 = vmatpush.bf16.msra.mxu1 %v422_v10 }
  0x2d   :  { %293 = vmatpush.bf16.msra.mxu2 %v430_v26 }
  0x2e   :  { %209 = vmatpush.bf16.msra.mxu1 %v421_v11 }
  0x31   :  { %294 = vmatpush.bf16.msra.mxu2 %v429_v27 }
  0x32   :  { %210 = vmatpush.bf16.msra.mxu1 %v420_v12 }
  0x35   :  { %295 = vmatpush.bf16.msra.mxu2 %v428_v28 }
  0x99   :  { %v127_v17 = vpop.f32.mrf.mxu0 }
  0x9a   :  { %v128_v19 = vadd.f32 %v445_v18, %v127_v17 }
  0x9c   :  { %v132_v22 = vmax.f32 %v128_v19, 0.0 }
  0xa1   :  { %v129_v20 = vpop.f32.mrf.mxu0 }
  0xa2   :  { %v130_v21 = vadd.f32 %v445_v18, %v129_v20 }
  0xa4   :  { %v133_v23 = vmax.f32 %v130_v21, 0.0 }
  0xa6   :  { %v134_v24 = vpack.c.bf16 %v133_v23, %v132_v22 }
  0xa8   :  { %211 = vmatmul.bf16.vlgmr.msra.gmra.mxu1 %v134_v24 }
 0x125   :  { %v212_v29 = vpop.f32.mrf.mxu1 }
 0x126   :  { %v213_v31 = vadd.f32 %v446_v30, %v212_v29 }
 0x128   :  { %v217_v34 = vmax.f32 %v213_v31, 0.0 }
 0x12d   :  { %v214_v32 = vpop.f32.mrf.mxu1 }
 0x12e   :  { %v215_v33 = vadd.f32 %v446_v30, %v214_v32 }
 0x130   :  { %v218_v35 = vmax.f32 %v215_v33, 0.0 }
 0x132   :  { %v219_v36 = vpack.c.bf16 %v218_v35, %v217_v34 }
 0x134   :  { %296 = vmatmul.bf16.vlgmr.msra.gmra.mxu2 %v219_v36 }
 0x1b7   :  { %v297_v38 = vpop.f32.mrf.mxu2 }
 0x1b8   :  { %v298_v39 = vadd.f32 %v447_v37, %v297_v38 }
 0x1ba   :  { %302 = vmax.xlane.f32.xlu0 %v298_v39 }
 0x1bf   :  { %v299_v40 = vpop.f32.mrf.mxu2 }
 0x1c0   :  { %v300_v41 = vadd.f32 %v447_v37, %v299_v40 }
 0x1c2   :  { %304 = vmax.xlane.f32.xlu0 %v300_v41 }
 0x22d   :  { %v303_v42 = vpop.xlane.xlu0 %302 }
 0x22e   :  { %v306_v43 = vsub.f32 %v298_v39, %v303_v42 }
 0x230   :  { %v308_v44 = vmul.f32 1.442695, %v306_v43 }
 0x232   :  { %448 = vpow2.f32 %v308_v44 }
 0x235   :  { %v305_v45 = vpop.xlane.xlu0 %304 }
 0x236   :  { %v307_v46 = vsub.f32 %v300_v41, %v305_v45 }
 0x238   :  { %v449_v47 = vpop.eup %448  ;;  %v310_v48 = vmul.f32 1.442695, %v307_v46 }
 0x239   :  { %312 = vadd.xlane.f32.xlu1 %v449_v47 }
 0x23a   :  { %450 = vpow2.f32 %v310_v48 }
 0x240   :  { %v451_v49 = vpop.eup %450 }
 0x241   :  { %314 = vadd.xlane.f32.xlu1 %v451_v49 }
 0x2ac   :  { %v313_v50 = vpop.xlane.xlu1 %312 }
 0x2ad   :  { %452 = vlog2.f32 %v313_v50 }
 0x2b3   :  { %v453_v51 = vpop.eup %452 }
 0x2b4   :  { %v317_v52 = vmul.f32 0.6931472, %v453_v51  ;;  %v315_v53 = vpop.xlane.xlu1 %314 }
 0x2b5   :  { %454 = vlog2.f32 %v315_v53 }
 0x2b6   :  { %v320_v54 = vsub.f32 %v306_v43, %v317_v52 }
 0x2b8   :  { %322 = vst [vmem:[#allocation10] sm:$0xff] %v320_v54 }
 0x2bb   :  { %v455_v55 = vpop.eup %454 }
 0x2bc   :  { %v319_v56 = vmul.f32 0.6931472, %v455_v55 }
 0x2be   :  { %v321_v57 = vsub.f32 %v307_v46, %v319_v56 }
 0x2c0   :  { %323 = vst [vmem:[#allocation10 + $0x8] sm:$0xff] %v321_v57 }
 0x2c1   :  { %336 = dma.vmem_to_hbm [thread:$0]  %s329_s6, 256, %s331_s28, [#allocation4], %s588_s13, %s588_s13, %s589_s14  }
 0x2c2   :  { %582 = dma.done.wait [#allocation4], 256  }
 0x2c3   :  { %583 = vsyncadd [#allocation4], 4294967040 }
 0x2c4   :  { %341 = vsyncpa [#allocation3], 1 }
 0x2c5   :  { %342 = vsyncpa [#allocation6], 1 }
 0x2c6   :  { %343 = vsyncpa [#allocation9], 1 }
 0x2c7   :  { %344 = vsyncpa [#allocation4], 1 }

</bundles_post_ra>
